<compile_context>
chip_gen: v7x
topology: tpu7x:2x2x1
jax: 0.10.0
libtpu: 0.0.40
codegen_flags: <defaults>
</compile_context>

<pallas_src>
import jax
import jax.numpy as jnp
from jax.experimental import pallas as pl
from jax.experimental.pallas import tpu as pltpu


# ---------------------------------------------------------------------------
# Kernel
# ---------------------------------------------------------------------------

def _layernorm_feat0(v, gamma, beta, eps=1e-5):
    """LayerNorm over the feature axis (axis 0) of a (F, TILE_B) tile."""
    mu = jnp.mean(v, axis=0, keepdims=True)
    var = jnp.mean(v * v, axis=0, keepdims=True) - mu * mu   # one-pass variance
    return (v - mu) * jax.lax.rsqrt(var + eps) * gamma + beta


def dnn_kernel(x_ref,                      # (TILE_B, in_features)
               w1n_ref, w1d_ref,           # (D2, in_features) row-gathers of W1
               g1_ref, b1_ref,             # (D2, 1)
               w2_ref,                     # (out2, D2)
               g2_ref, b2_ref,             # (out2, 1)
               w3_ref,                     # (out2, out2)
               g3_ref, b3_ref,             # (out2, 1)
               wo_ref, bo_ref,             # (out2, 1), (1, 1)
               out_ref):                   # (1, TILE_B)
    x = x_ref[...]                                           # (TILE_B, in)

    # Transposed problem: contract the shared `in` axis, keep batch on lanes.
    cdims = (((1,), (1,)), ((), ()))                         # A @ B^T
    # ratio(): numerator/denominator rows of linear1 were pre-gathered into
    # w1n / w1d, so ratio is just two matmuls + a divide.
    num = jax.lax.dot_general(w1n_ref[...], x, cdims,
                              preferred_element_type=jnp.float32) + 1.0   # (D2, TB)
    den = jax.lax.dot_general(w1d_ref[...], x, cdims,
                              preferred_element_type=jnp.float32) + 1.0   # (D2, TB)
    r = num / den

    # LayerNorm over D2
    z = _layernorm_feat0(r, g1_ref[...], b1_ref[...])

    # linear2 -> ReLU -> LayerNorm   (Dropout = identity in eval)
    h2 = jnp.dot(w2_ref[...], z, preferred_element_type=jnp.float32)
    h2 = jnp.maximum(h2, 0.0)
    h2 = _layernorm_feat0(h2, g2_ref[...], b2_ref[...])

    # linear3 -> ReLU -> LayerNorm   (Dropout = identity in eval)
    h3 = jnp.dot(w3_ref[...], h2, preferred_element_type=jnp.float32)
    h3 = jnp.maximum(h3, 0.0)
    h3 = _layernorm_feat0(h3, g3_ref[...], b3_ref[...])

    # Output Linear (out_features=1): VPU multiply + sublane reduce, no MXU.
    y = jnp.sum(h3 * wo_ref[...], axis=0, keepdims=True) + bo_ref[...]    # (1, TB)
    out_ref[...] = y.astype(out_ref.dtype)


# ---------------------------------------------------------------------------
# Wrapper
# ---------------------------------------------------------------------------

def prepare_params(params):
    """One-time re-arrangement of PyTorch-layout params for the kernel."""
    w1 = params["w1"]                      # (out1, in_features)
    out1 = w1.shape[0]
    num_idx, den_idx = [], []
    for i in range(out1 - 1):
        for j in range(i + 1, out1):
            num_idx.append(j)
            den_idx.append(i)
    num_idx = jnp.array(num_idx, jnp.int32)
    den_idx = jnp.array(den_idx, jnp.int32)
    return dict(
        w1n=w1[num_idx, :],                # (D2, in)  numerator rows of W1
        w1d=w1[den_idx, :],                # (D2, in)  denominator rows of W1
        g1=params["g1"][:, None], b1=params["b1"][:, None],
        w2=params["w2"],                   # (out2, D2)
        g2=params["g2"][:, None], b2=params["b2"][:, None],
        w3=params["w3"],                   # (out2, out2)
        g3=params["g3"][:, None], b3=params["b3"][:, None],
        wo=params["wo"].reshape(-1, 1),    # (out2, 1)
        bo=params["bo"].reshape(1, 1),     # (1, 1)
    )


def dnn_forward(x, prep, tile_b=512):
    B, _ = x.shape
    # Tile the batch on the lane axis; tiles are multiples of 128.
    tile_b = int(min(tile_b, pl.cdiv(B, 128) * 128))
    bp = pl.cdiv(B, tile_b) * tile_b
    if bp != B:
        x = jnp.pad(x, ((0, bp - B), (0, 0)))
    grid = (bp // tile_b,)

    def const_spec(a):
        return pl.BlockSpec(a.shape, lambda i: (0, 0))       # VMEM-resident

    order = ("w1n", "w1d", "g1", "b1", "w2", "g2", "b2",
             "w3", "g3", "b3", "wo", "bo")
    weights = [prep[k] for k in order]

    out = pl.pallas_call(
        dnn_kernel,
        out_shape=jax.ShapeDtypeStruct((1, bp), jnp.float32),
        grid_spec=pltpu.PrefetchScalarGridSpec(
            num_scalar_prefetch=0,
            grid=grid,
            in_specs=[pl.BlockSpec((tile_b, x.shape[1]), lambda i: (i, 0))]
                     + [const_spec(w) for w in weights],
            out_specs=pl.BlockSpec((1, tile_b), lambda i: (0, i)),
        ),
        compiler_params=pltpu.CompilerParams(
            dimension_semantics=("parallel",)),
    )(x, *weights)

    return out[0, :B][:, None]                               # (B, 1)


# ---------------------------------------------------------------------------
# Pure-JAX reference (mirrors the PyTorch module) and param init
# ---------------------------------------------------------------------------

def _layernorm_ref(v, gamma, beta, eps=1e-5):
    mu = jnp.mean(v, axis=-1, keepdims=True)
    var = jnp.mean((v - mu) ** 2, axis=-1, keepdims=True)
    return (v - mu) * jax.lax.rsqrt(var + eps) * gamma + beta


def _ratio_ref(h):
    hp1 = h + 1.0
    parts = [hp1[:, i + 1:] / hp1[:, i:i + 1] for i in range(h.shape[1] - 1)]
    return jnp.concatenate(parts, axis=1)


def dnn_reference(x, params):
    h1 = x @ params["w1"].T
    z = _layernorm_ref(_ratio_ref(h1), params["g1"], params["b1"])
    h2 = jnp.maximum(z @ params["w2"].T, 0.0)
    h2 = _layernorm_ref(h2, params["g2"], params["b2"])
    h3 = jnp.maximum(h2 @ params["w3"].T, 0.0)
    h3 = _layernorm_ref(h3, params["g3"], params["b3"])
    return h3 @ params["wo"].T + params["bo"][None, :]


def init_params(key, in_features, out1):
    d2 = out1 * (out1 - 1) // 2
    out2 = d2 // 2
    ks = jax.random.split(key, 11)
    s = 0.1
    return {
        # PyTorch Linear weight layout: (out_features, in_features)
        "w1": s * jax.random.normal(ks[0], (out1, in_features), jnp.float32),
        "w2": s * jax.random.normal(ks[1], (out2, d2), jnp.float32),
        "w3": s * jax.random.normal(ks[2], (out2, out2), jnp.float32),
        "wo": s * jax.random.normal(ks[3], (1, out2), jnp.float32),
        "bo": s * jax.random.normal(ks[4], (1,), jnp.float32),
        # non-trivial LayerNorm params so element ordering is actually tested
        "g1": 1.0 + s * jax.random.normal(ks[5], (d2,), jnp.float32),
        "b1": s * jax.random.normal(ks[6], (d2,), jnp.float32),
        "g2": 1.0 + s * jax.random.normal(ks[7], (out2,), jnp.float32),
        "b2": s * jax.random.normal(ks[8], (out2,), jnp.float32),
        "g3": 1.0 + s * jax.random.normal(ks[9], (out2,), jnp.float32),
        "b3": s * jax.random.normal(ks[10], (out2,), jnp.float32),
    }


if __name__ == "__main__":
    batch, in_features, out1 = 256, 16, 8        # -> D2 = 28, out2 = 14
    key = jax.random.PRNGKey(0)
    kx, kp = jax.random.split(key)
    x = jax.random.normal(kx, (batch, in_features), jnp.float32)
    params = init_params(kp, in_features, out1)
    prep = prepare_params(params)                # one-time weight re-layout

    fwd = jax.jit(dnn_forward, static_argnames=("tile_b",))
    y = jax.block_until_ready(fwd(x, prep, tile_b=128))      # grid = (2,)

    y_ref = dnn_reference(x, params)
    assert y.shape == (batch, 1), y.shape
    assert jnp.allclose(y, y_ref, atol=5e-4, rtol=5e-4), (
        float(jnp.max(jnp.abs(y - y_ref))))

    print("KERNEL_OK")
</pallas_src>

<mosaic_0001>
module attributes {stable_mosaic.version = 11 : i64} {
  func.func @dnn_kernel(%arg0: i32, %arg1: memref<128x16xf32, #tpu.memory_space<vmem>>, %arg2: memref<28x16xf32, #tpu.memory_space<vmem>>, %arg3: memref<28x16xf32, #tpu.memory_space<vmem>>, %arg4: memref<28x1xf32, #tpu.memory_space<vmem>>, %arg5: memref<28x1xf32, #tpu.memory_space<vmem>>, %arg6: memref<14x28xf32, #tpu.memory_space<vmem>>, %arg7: memref<14x1xf32, #tpu.memory_space<vmem>>, %arg8: memref<14x1xf32, #tpu.memory_space<vmem>>, %arg9: memref<14x14xf32, #tpu.memory_space<vmem>>, %arg10: memref<14x1xf32, #tpu.memory_space<vmem>>, %arg11: memref<14x1xf32, #tpu.memory_space<vmem>>, %arg12: memref<14x1xf32, #tpu.memory_space<vmem>>, %arg13: memref<1x1xf32, #tpu.memory_space<vmem>>, %arg14: memref<1x128xf32, #tpu.memory_space<vmem>>) attributes {dimension_semantics = [#tpu.dimension_semantics<parallel>], iteration_bounds = array<i64: 2>, scalar_prefetch = 0 : i64, scratch_operands = 0 : i64, tpu.core_type = #tpu.core_type<tc>, window_params = [{transform_indices = @transform_0, window_bounds = array<i64: 128, 16>}, {pipeline_mode = #tpu.pipeline_mode<synchronous>, transform_indices = @transform_1, window_bounds = array<i64: 28, 16>}, {pipeline_mode = #tpu.pipeline_mode<synchronous>, transform_indices = @transform_2, window_bounds = array<i64: 28, 16>}, {pipeline_mode = #tpu.pipeline_mode<synchronous>, transform_indices = @transform_3, window_bounds = array<i64: 28, 1>}, {pipeline_mode = #tpu.pipeline_mode<synchronous>, transform_indices = @transform_4, window_bounds = array<i64: 28, 1>}, {pipeline_mode = #tpu.pipeline_mode<synchronous>, transform_indices = @transform_5, window_bounds = array<i64: 14, 28>}, {pipeline_mode = #tpu.pipeline_mode<synchronous>, transform_indices = @transform_6, window_bounds = array<i64: 14, 1>}, {pipeline_mode = #tpu.pipeline_mode<synchronous>, transform_indices = @transform_7, window_bounds = array<i64: 14, 1>}, {pipeline_mode = #tpu.pipeline_mode<synchronous>, transform_indices = @transform_8, window_bounds = array<i64: 14, 14>}, {pipeline_mode = #tpu.pipeline_mode<synchronous>, transform_indices = @transform_9, window_bounds = array<i64: 14, 1>}, {pipeline_mode = #tpu.pipeline_mode<synchronous>, transform_indices = @transform_10, window_bounds = array<i64: 14, 1>}, {pipeline_mode = #tpu.pipeline_mode<synchronous>, transform_indices = @transform_11, window_bounds = array<i64: 14, 1>}, {pipeline_mode = #tpu.pipeline_mode<synchronous>, transform_indices = @transform_12, window_bounds = array<i64: 1, 1>}, {transform_indices = @transform_13, window_bounds = array<i64: 1, 128>}]} {
    %c0 = arith.constant 0 : index
    %c0_0 = arith.constant 0 : index
    %0 = vector.load %arg1[%c0, %c0_0] : memref<128x16xf32, #tpu.memory_space<vmem>>, vector<128x16xf32>
    %c0_1 = arith.constant 0 : index
    %c0_2 = arith.constant 0 : index
    %1 = vector.load %arg2[%c0_1, %c0_2] : memref<28x16xf32, #tpu.memory_space<vmem>>, vector<28x16xf32>
    %cst = arith.constant dense<0.000000e+00> : vector<28x128xf32>
    %2 = tpu.matmul %1, %0, %cst {dimension_numbers = #tpu.dot_dimension_numbers<[1], [1], [0], [0], [0, 0, 1, 0], [], []>} : vector<28x16xf32>, vector<128x16xf32>, vector<28x128xf32> -> vector<28x128xf32>
    %cst_3 = arith.constant 1.000000e+00 : f32
    %3 = vector.broadcast %cst_3 : f32 to vector<28x128xf32>
    %4 = arith.addf %2, %3 : vector<28x128xf32>
    %c0_4 = arith.constant 0 : index
    %c0_5 = arith.constant 0 : index
    %5 = vector.load %arg3[%c0_4, %c0_5] : memref<28x16xf32, #tpu.memory_space<vmem>>, vector<28x16xf32>
    %cst_6 = arith.constant dense<0.000000e+00> : vector<28x128xf32>
    %6 = tpu.matmul %5, %0, %cst_6 {dimension_numbers = #tpu.dot_dimension_numbers<[1], [1], [0], [0], [0, 0, 1, 0], [], []>} : vector<28x16xf32>, vector<128x16xf32>, vector<28x128xf32> -> vector<28x128xf32>
    %cst_7 = arith.constant 1.000000e+00 : f32
    %7 = vector.broadcast %cst_7 : f32 to vector<28x128xf32>
    %8 = arith.addf %6, %7 : vector<28x128xf32>
    %9 = arith.divf %4, %8 : vector<28x128xf32>
    %c0_8 = arith.constant 0 : index
    %c0_9 = arith.constant 0 : index
    %10 = vector.load %arg4[%c0_8, %c0_9] : memref<28x1xf32, #tpu.memory_space<vmem>>, vector<28x1xf32>
    %c0_10 = arith.constant 0 : index
    %c0_11 = arith.constant 0 : index
    %11 = vector.load %arg5[%c0_10, %c0_11] : memref<28x1xf32, #tpu.memory_space<vmem>>, vector<28x1xf32>
    %cst_12 = arith.constant dense<0.000000e+00> : vector<128xf32>
    %12 = vector.multi_reduction <add>, %9, %cst_12 [0] : vector<28x128xf32> to vector<128xf32>
    %13 = vector.shape_cast %12 : vector<128xf32> to vector<1x128xf32>
    %cst_13 = arith.constant 2.800000e+01 : f32
    %14 = vector.broadcast %cst_13 : f32 to vector<1x128xf32>
    %15 = arith.divf %13, %14 : vector<1x128xf32>
    %16 = arith.mulf %9, %9 : vector<28x128xf32>
    %cst_14 = arith.constant dense<0.000000e+00> : vector<128xf32>
    %17 = vector.multi_reduction <add>, %16, %cst_14 [0] : vector<28x128xf32> to vector<128xf32>
    %18 = vector.shape_cast %17 : vector<128xf32> to vector<1x128xf32>
    %cst_15 = arith.constant 2.800000e+01 : f32
    %19 = vector.broadcast %cst_15 : f32 to vector<1x128xf32>
    %20 = arith.divf %18, %19 : vector<1x128xf32>
    %21 = arith.mulf %15, %15 : vector<1x128xf32>
    %22 = arith.subf %20, %21 : vector<1x128xf32>
    %23 = vector.broadcast %15 : vector<1x128xf32> to vector<28x128xf32>
    %24 = arith.subf %9, %23 : vector<28x128xf32>
    %cst_16 = arith.constant 9.99999974E-6 : f32
    %25 = vector.broadcast %cst_16 : f32 to vector<1x128xf32>
    %26 = arith.addf %22, %25 : vector<1x128xf32>
    %27 = math.rsqrt %26 : vector<1x128xf32>
    %28 = vector.broadcast %27 : vector<1x128xf32> to vector<28x128xf32>
    %29 = arith.mulf %24, %28 : vector<28x128xf32>
    %30 = vector.broadcast %10 : vector<28x1xf32> to vector<28x128xf32>
    %31 = arith.mulf %29, %30 : vector<28x128xf32>
    %32 = vector.broadcast %11 : vector<28x1xf32> to vector<28x128xf32>
    %33 = arith.addf %31, %32 : vector<28x128xf32>
    %c0_17 = arith.constant 0 : index
    %c0_18 = arith.constant 0 : index
    %34 = vector.load %arg6[%c0_17, %c0_18] : memref<14x28xf32, #tpu.memory_space<vmem>>, vector<14x28xf32>
    %cst_19 = arith.constant dense<0.000000e+00> : vector<14x128xf32>
    %35 = tpu.matmul %34, %33, %cst_19 {dimension_numbers = #tpu.dot_dimension_numbers<[1], [0], [0], [1], [0, 0, 1, 1], [], []>} : vector<14x28xf32>, vector<28x128xf32>, vector<14x128xf32> -> vector<14x128xf32>
    %cst_20 = arith.constant 0.000000e+00 : f32
    %36 = vector.broadcast %cst_20 : f32 to vector<14x128xf32>
    %37 = arith.maximumf %35, %36 : vector<14x128xf32>
    %c0_21 = arith.constant 0 : index
    %c0_22 = arith.constant 0 : index
    %38 = vector.load %arg7[%c0_21, %c0_22] : memref<14x1xf32, #tpu.memory_space<vmem>>, vector<14x1xf32>
    %c0_23 = arith.constant 0 : index
    %c0_24 = arith.constant 0 : index
    %39 = vector.load %arg8[%c0_23, %c0_24] : memref<14x1xf32, #tpu.memory_space<vmem>>, vector<14x1xf32>
    %cst_25 = arith.constant dense<0.000000e+00> : vector<128xf32>
    %40 = vector.multi_reduction <add>, %37, %cst_25 [0] : vector<14x128xf32> to vector<128xf32>
    %41 = vector.shape_cast %40 : vector<128xf32> to vector<1x128xf32>
    %cst_26 = arith.constant 1.400000e+01 : f32
    %42 = vector.broadcast %cst_26 : f32 to vector<1x128xf32>
    %43 = arith.divf %41, %42 : vector<1x128xf32>
    %44 = arith.mulf %37, %37 : vector<14x128xf32>
    %cst_27 = arith.constant dense<0.000000e+00> : vector<128xf32>
    %45 = vector.multi_reduction <add>, %44, %cst_27 [0] : vector<14x128xf32> to vector<128xf32>
    %46 = vector.shape_cast %45 : vector<128xf32> to vector<1x128xf32>
    %cst_28 = arith.constant 1.400000e+01 : f32
    %47 = vector.broadcast %cst_28 : f32 to vector<1x128xf32>
    %48 = arith.divf %46, %47 : vector<1x128xf32>
    %49 = arith.mulf %43, %43 : vector<1x128xf32>
    %50 = arith.subf %48, %49 : vector<1x128xf32>
    %51 = vector.broadcast %43 : vector<1x128xf32> to vector<14x128xf32>
    %52 = arith.subf %37, %51 : vector<14x128xf32>
    %cst_29 = arith.constant 9.99999974E-6 : f32
    %53 = vector.broadcast %cst_29 : f32 to vector<1x128xf32>
    %54 = arith.addf %50, %53 : vector<1x128xf32>
    %55 = math.rsqrt %54 : vector<1x128xf32>
    %56 = vector.broadcast %55 : vector<1x128xf32> to vector<14x128xf32>
    %57 = arith.mulf %52, %56 : vector<14x128xf32>
    %58 = vector.broadcast %38 : vector<14x1xf32> to vector<14x128xf32>
    %59 = arith.mulf %57, %58 : vector<14x128xf32>
    %60 = vector.broadcast %39 : vector<14x1xf32> to vector<14x128xf32>
    %61 = arith.addf %59, %60 : vector<14x128xf32>
    %c0_30 = arith.constant 0 : index
    %c0_31 = arith.constant 0 : index
    %62 = vector.load %arg9[%c0_30, %c0_31] : memref<14x14xf32, #tpu.memory_space<vmem>>, vector<14x14xf32>
    %cst_32 = arith.constant dense<0.000000e+00> : vector<14x128xf32>
    %63 = tpu.matmul %62, %61, %cst_32 {dimension_numbers = #tpu.dot_dimension_numbers<[1], [0], [0], [1], [0, 0, 1, 1], [], []>} : vector<14x14xf32>, vector<14x128xf32>, vector<14x128xf32> -> vector<14x128xf32>
    %cst_33 = arith.constant 0.000000e+00 : f32
    %64 = vector.broadcast %cst_33 : f32 to vector<14x128xf32>
    %65 = arith.maximumf %63, %64 : vector<14x128xf32>
    %c0_34 = arith.constant 0 : index
    %c0_35 = arith.constant 0 : index
    %66 = vector.load %arg10[%c0_34, %c0_35] : memref<14x1xf32, #tpu.memory_space<vmem>>, vector<14x1xf32>
    %c0_36 = arith.constant 0 : index
    %c0_37 = arith.constant 0 : index
    %67 = vector.load %arg11[%c0_36, %c0_37] : memref<14x1xf32, #tpu.memory_space<vmem>>, vector<14x1xf32>
    %cst_38 = arith.constant dense<0.000000e+00> : vector<128xf32>
    %68 = vector.multi_reduction <add>, %65, %cst_38 [0] : vector<14x128xf32> to vector<128xf32>
    %69 = vector.shape_cast %68 : vector<128xf32> to vector<1x128xf32>
    %cst_39 = arith.constant 1.400000e+01 : f32
    %70 = vector.broadcast %cst_39 : f32 to vector<1x128xf32>
    %71 = arith.divf %69, %70 : vector<1x128xf32>
    %72 = arith.mulf %65, %65 : vector<14x128xf32>
    %cst_40 = arith.constant dense<0.000000e+00> : vector<128xf32>
    %73 = vector.multi_reduction <add>, %72, %cst_40 [0] : vector<14x128xf32> to vector<128xf32>
    %74 = vector.shape_cast %73 : vector<128xf32> to vector<1x128xf32>
    %cst_41 = arith.constant 1.400000e+01 : f32
    %75 = vector.broadcast %cst_41 : f32 to vector<1x128xf32>
    %76 = arith.divf %74, %75 : vector<1x128xf32>
    %77 = arith.mulf %71, %71 : vector<1x128xf32>
    %78 = arith.subf %76, %77 : vector<1x128xf32>
    %79 = vector.broadcast %71 : vector<1x128xf32> to vector<14x128xf32>
    %80 = arith.subf %65, %79 : vector<14x128xf32>
    %cst_42 = arith.constant 9.99999974E-6 : f32
    %81 = vector.broadcast %cst_42 : f32 to vector<1x128xf32>
    %82 = arith.addf %78, %81 : vector<1x128xf32>
    %83 = math.rsqrt %82 : vector<1x128xf32>
    %84 = vector.broadcast %83 : vector<1x128xf32> to vector<14x128xf32>
    %85 = arith.mulf %80, %84 : vector<14x128xf32>
    %86 = vector.broadcast %66 : vector<14x1xf32> to vector<14x128xf32>
    %87 = arith.mulf %85, %86 : vector<14x128xf32>
    %88 = vector.broadcast %67 : vector<14x1xf32> to vector<14x128xf32>
    %89 = arith.addf %87, %88 : vector<14x128xf32>
    %c0_43 = arith.constant 0 : index
    %c0_44 = arith.constant 0 : index
    %90 = vector.load %arg12[%c0_43, %c0_44] : memref<14x1xf32, #tpu.memory_space<vmem>>, vector<14x1xf32>
    %91 = vector.broadcast %90 : vector<14x1xf32> to vector<14x128xf32>
    %92 = arith.mulf %89, %91 : vector<14x128xf32>
    %cst_45 = arith.constant dense<0.000000e+00> : vector<128xf32>
    %93 = vector.multi_reduction <add>, %92, %cst_45 [0] : vector<14x128xf32> to vector<128xf32>
    %94 = vector.shape_cast %93 : vector<128xf32> to vector<1x128xf32>
    %c0_46 = arith.constant 0 : index
    %c0_47 = arith.constant 0 : index
    %95 = vector.load %arg13[%c0_46, %c0_47] : memref<1x1xf32, #tpu.memory_space<vmem>>, vector<1x1xf32>
    %96 = vector.broadcast %95 : vector<1x1xf32> to vector<1x128xf32>
    %97 = arith.addf %94, %96 : vector<1x128xf32>
    %c0_48 = arith.constant 0 : index
    %c0_49 = arith.constant 0 : index
    %98 = vector.load %arg14[%c0_48, %c0_49] : memref<1x128xf32, #tpu.memory_space<vmem>>, vector<1x128xf32>
    tpu.vector_store %arg14[%c0_48, %c0_49], %97 {strides = array<i32>} : memref<1x128xf32, #tpu.memory_space<vmem>>, vector<1x128xf32>,
    return
  }
  func.func @transform_0(%arg0: i32) -> (i32, i32) {
    %c0_i32 = arith.constant 0 : i32
    %c0_i32_0 = arith.constant 0 : i32
    return %arg0, %c0_i32 : i32, i32
  }
  func.func @transform_1(%arg0: i32) -> (i32, i32) {
    %c0_i32 = arith.constant 0 : i32
    %c0_i32_0 = arith.constant 0 : i32
    %c0_i32_1 = arith.constant 0 : i32
    return %c0_i32, %c0_i32_0 : i32, i32
  }
  func.func @transform_2(%arg0: i32) -> (i32, i32) {
    %c0_i32 = arith.constant 0 : i32
    %c0_i32_0 = arith.constant 0 : i32
    %c0_i32_1 = arith.constant 0 : i32
    return %c0_i32, %c0_i32_0 : i32, i32
  }
  func.func @transform_3(%arg0: i32) -> (i32, i32) {
    %c0_i32 = arith.constant 0 : i32
    %c0_i32_0 = arith.constant 0 : i32
    %c0_i32_1 = arith.constant 0 : i32
    return %c0_i32, %c0_i32_0 : i32, i32
  }
  func.func @transform_4(%arg0: i32) -> (i32, i32) {
    %c0_i32 = arith.constant 0 : i32
    %c0_i32_0 = arith.constant 0 : i32
    %c0_i32_1 = arith.constant 0 : i32
    return %c0_i32, %c0_i32_0 : i32, i32
  }
  func.func @transform_5(%arg0: i32) -> (i32, i32) {
    %c0_i32 = arith.constant 0 : i32
    %c0_i32_0 = arith.constant 0 : i32
    %c0_i32_1 = arith.constant 0 : i32
    return %c0_i32, %c0_i32_0 : i32, i32
  }
  func.func @transform_6(%arg0: i32) -> (i32, i32) {
    %c0_i32 = arith.constant 0 : i32
    %c0_i32_0 = arith.constant 0 : i32
    %c0_i32_1 = arith.constant 0 : i32
    return %c0_i32, %c0_i32_0 : i32, i32
  }
  func.func @transform_7(%arg0: i32) -> (i32, i32) {
    %c0_i32 = arith.constant 0 : i32
    %c0_i32_0 = arith.constant 0 : i32
    %c0_i32_1 = arith.constant 0 : i32
    return %c0_i32, %c0_i32_0 : i32, i32
  }
  func.func @transform_8(%arg0: i32) -> (i32, i32) {
    %c0_i32 = arith.constant 0 : i32
    %c0_i32_0 = arith.constant 0 : i32
    %c0_i32_1 = arith.constant 0 : i32
    return %c0_i32, %c0_i32_0 : i32, i32
  }
  func.func @transform_9(%arg0: i32) -> (i32, i32) {
    %c0_i32 = arith.constant 0 : i32
    %c0_i32_0 = arith.constant 0 : i32
    %c0_i32_1 = arith.constant 0 : i32
    return %c0_i32, %c0_i32_0 : i32, i32
  }
  func.func @transform_10(%arg0: i32) -> (i32, i32) {
    %c0_i32 = arith.constant 0 : i32
    %c0_i32_0 = arith.constant 0 : i32
    %c0_i32_1 = arith.constant 0 : i32
    return %c0_i32, %c0_i32_0 : i32, i32
  }
  func.func @transform_11(%arg0: i32) -> (i32, i32) {
    %c0_i32 = arith.constant 0 : i32
    %c0_i32_0 = arith.constant 0 : i32
    %c0_i32_1 = arith.constant 0 : i32
    return %c0_i32, %c0_i32_0 : i32, i32
  }
  func.func @transform_12(%arg0: i32) -> (i32, i32) {
    %c0_i32 = arith.constant 0 : i32
    %c0_i32_0 = arith.constant 0 : i32
    %c0_i32_1 = arith.constant 0 : i32
    return %c0_i32, %c0_i32_0 : i32, i32
  }
  func.func @transform_13(%arg0: i32) -> (i32, i32) {
    %c0_i32 = arith.constant 0 : i32
    %c0_i32_0 = arith.constant 0 : i32
    return %c0_i32, %arg0 : i32, i32
  }
}

</mosaic_0001>

<bundles_post_ra>
// kernel: dnn_forward.1
= control target key start
LH: loop header
LB: loop body
LE: loop exit
PB: predicated region body
PF: predicated region fallthrough
CT: control target
= control target key end

     0   :  { %s2015_s0 = inlined_call_operand.vmem [shape: f32[256,16], index: 0, kind: input, shape index: {}]   ;;  %s2016_s1 = inlined_call_operand.vmem [shape: f32[28,16], index: 1, kind: input, shape index: {}]   ;;  %s2017_s2 = inlined_call_operand.vmem [shape: f32[28,16], index: 2, kind: input, shape index: {}]   ;;  %s2018_s3 = inlined_call_operand.vmem [shape: f32[28,1], index: 3, kind: input, shape index: {}]   ;;  %s2019_s4 = inlined_call_operand.vmem [shape: f32[28,1], index: 4, kind: input, shape index: {}]   ;;  %s2020_s5 = inlined_call_operand.vmem [shape: f32[14,28], index: 5, kind: input, shape index: {}]   ;;  %s2021_s6 = inlined_call_operand.vmem [shape: f32[14,1], index: 6, kind: input, shape index: {}]   ;;  %s2022_s7 = inlined_call_operand.vmem [shape: f32[14,1], index: 7, kind: input, shape index: {}]   ;;  %s2023_s8 = inlined_call_operand.vmem [shape: f32[14,14], index: 8, kind: input, shape index: {}]   ;;  %s2024_s9 = inlined_call_operand.vmem [shape: f32[14,1], index: 9, kind: input, shape index: {}]   ;;  %s2025_s10 = inlined_call_operand.vmem [shape: f32[14,1], index: 10, kind: input, shape index: {}]   ;;  %s2026_s11 = inlined_call_operand.vmem [shape: f32[14,1], index: 11, kind: input, shape index: {}]   ;;  %s2027_s12 = inlined_call_operand.<no memory space> [shape: f32[1,1], index: 12, kind: input, shape index: {}]   ;;  %s2028_s13 = inlined_call_operand.hbm [shape: f32[1,256], index: 13, kind: output, shape index: {}]  }
   0x1   :  { %v18_v0 = vstv %s2027_s12 }
   0x2   :  { %19 = vst [vmem:[#allocation2] sm:$0x1] %v18_v0 }
   0x3   :  { %20 = vsyncpa [#allocation4], 0 }
   0x4   :  { %22 = vsyncpa [#allocation4 + $0x1], 0  ;;  %s1715_s27 = smov 0   ;;  %s1717_s28 = smov 0  }
   0x5   :  { %s1719_s29 = smov 0   ;;  %s1721_s30 = smov 0  }
   0x6 LB: > { %2032 = sst [smem:[#allocation6_spill]] %s1633_s29  ;;  %s1206_s12 = sadd.s32 4294967295, %s1637_s30   ;;  %s1637_s30 = sphi %s1721_s30, %s2039_s30   ;;  %s1633_s29 = sphi %s1719_s29, %s2041_s29   ;;  %s1629_s28 = sphi %s1717_s28, %s2043_s28   ;;  %s1625_s27 = sphi %s1715_s27, %s2042_s27  }
   0x7   : > { %s1207_s14 = sadd.s32 4294967294, %s1637_s30   ;;  %s1738_s15 = sadd.s32 1, %s1637_s30  }
   0x8   : > { %2033 = sst [smem:[#allocation7_spill]] %s1738_s15  ;;  %s313_s16 = sadd.s32 1, %s1633_s29 }
   0x9   : > { %s310_s17 = ssub.s32 %s1637_s30, %s1738_s15  ;;  %p323_p0 = scmp.ne.s32.totalorder %s1633_s29, %s1629_s28 }
   0xa   : > { %p311_p1 = scmp.eq.s32.totalorder %s310_s17, 0  ;;  %p324_p2 = scmp.eq.s32.totalorder %s1206_s12, 1 }
   0xb   : > { %p329_p3 = scmp.ne.s32.totalorder %s1629_s28, %s1625_s27  ;;  %p330_p4 = scmp.eq.s32.totalorder %s1207_s14, 1 }
   0xc   : > { %s1748_s18 = scalar_select %p311_p1, %s1633_s29, %s313_s16  }
   0xd   : > { %p1750_p5 = por %p324_p2, %p323_p0  ;;  %p1754_p6 = por %p330_p4, %p329_p3 }
   0xe   : > { %2034 = sst [smem:[#allocation8_spill]] %s1748_s18  ;;  %p1210_p7 = scmp.ge.s32.totalorder %s1637_s30, 1 }
   0xf   : > { %p393_p8 = scmp.lt.s32.totalorder %s1637_s30, 3 }
  0x11   : > { %p394_p9 = pnand %p1210_p7, %p393_p8 }
  0x12   : > { %s1760_s21 = sshll.u32 (!%p394_p9), %s1206_s12, 4  ;;  %vm462_vm0 = vcmask (!%p394_p9), 130048   ;;  %v608_v1 = vld [vmem:[%s2017_s2] sm:$0xff] (!%p394_p9)  ;;  %v1639_v3 = vmov (!%p394_p9), 0   ;;  %v718_v6 = vld [vmem:[%s2018_s3 + $0x8] sm:$0xff] (!%p394_p9)  ;;  %v719_v15 = vld [vmem:[%s2018_s3 + $0x10] sm:$0xff] (!%p394_p9) }
  0x13   : > { %397 = sbr.rel (%p394_p9) target bundleno = 927 (0x39f), region = 72  ;;  %p437_p10 = scmp.lt.s32.totalorder (!%p394_p9), %s1760_s21, 31  ;;  %1382 = vmatprep.mubr.msk.f32.mxu1 (!%p394_p9), %vm462_vm0, %v608_v1  ;;  %v458_v2 = vld [vmem:[%s2016_s1] sm:$0xff] (!%p394_p9)  ;;  %1559 = vset.pattern.permute.xlu0 (!%p394_p9), %v1639_v3  ;;  %v722_v7 = vld [vmem:[%s2019_s4 + $0x8] sm:$0xff] (!%p394_p9)  ;;  %vm1791_vm1 = vmpackc.low (!%p394_p9), %vm462_vm0, %vm462_vm0  ;;  %vm815_vm2 = vcmask (!%p394_p9), 228352   ;;  %vm727_vm3 = vcmask (!%p394_p9), 1043456  }
  0x14   : > { %1344 = vmatprep.mubr.msk.f32.mxu0 (!%p394_p9), %vm462_vm0, %v458_v2  ;;  %1560 = vset.pattern.permute.xlu1 (!%p394_p9), %v1639_v3  ;;  %v717_v4 = vld [vmem:[%s2018_s3] sm:$0xff] (!%p394_p9)  ;;  %v720_v16 = vld [vmem:[%s2018_s3 + $0x18] sm:$0xf] (!%p394_p9)  ;;  %v723_v19 = vld [vmem:[%s2019_s4 + $0x10] sm:$0xff] (!%p394_p9)  ;;  %vm1640_vm4 = vmmov (!%p394_p9), 1   ;;  %vm962_vm6 = vcmask (!%p394_p9), 113664   ;;  %s1973_s17 = scalar_lea.hbm (!%p394_p9), %s2028_s13, %s1760_s21 }
  0x15   : > { %v721_v5 = vld [vmem:[%s2019_s4] sm:$0xff] (!%p394_p9)  ;;  %767 = vperm.xlu0 (!%p394_p9), %1559, %v717_v4   ;;  %v724_v20 = vld [vmem:[%s2019_s4 + $0x18] sm:$0xf] (!%p394_p9)  ;;  %v903_v23 = vld [vmem:[%s2021_s6 + $0x8] sm:$0x3f] (!%p394_p9)  ;;  %vm906_vm7 = vcmask (!%p394_p9), 1045504  }
  0x16   : > { %791 = vperm.xlu1 (!%p394_p9), %1560, %v721_v5   ;;  %v902_v22 = vld [vmem:[%s2021_s6] sm:$0xff] (!%p394_p9)  ;;  %v905_v27 = vld [vmem:[%s2022_s7 + $0x8] sm:$0x3f] (!%p394_p9)  ;;  %v610_v50 = vld [vmem:[%s2017_s2 + $0x10] sm:$0xff] (!%p394_p9)  ;;  %s434_s18 = sand.u32 (!%p394_p9), 1, %s1629_s28   ;;  %s1641_s24 = smov (!%p394_p9), [#allocation3]  }
  0x17   : > { %v904_v26 = vld [vmem:[%s2022_s7] sm:$0xff] (!%p394_p9)  ;;  %v1050_v29 = vld [vmem:[%s2024_s9 + $0x8] sm:$0x3f] (!%p394_p9)  ;;  %v460_v51 = vld [vmem:[%s2016_s1 + $0x10] sm:$0xff] (!%p394_p9)  ;;  %s1579_s25 = sshll.u32 (!%p394_p9), %s1641_s24, 4  ;;  %s1580_s25 = int_to_ptr.vmem [resolvable:$false] %s1579_s25 }
  0x18   : > { %v1049_v30 = vld [vmem:[%s2024_s9] sm:$0xff] (!%p394_p9)  ;;  %v1052_v33 = vld [vmem:[%s2025_s10 + $0x8] sm:$0x3f] (!%p394_p9)  ;;  %v611_v52 = vld [vmem:[%s2017_s2 + $0x18] sm:$0xf] (!%p394_p9)  ;;  %s1581_s29 = scalar_lea.vmem (!%p394_p9), %s1580_s25, 32 }
  0x19   : > { %772 = vperm.xlu0 (!%p394_p9), %1559, %v718_v6   ;;  %v1051_v34 = vld [vmem:[%s2025_s10] sm:$0xff] (!%p394_p9)  ;;  %v1106_v36 = vld [vmem:[%s2026_s11 + $0x8] sm:$0x3f] (!%p394_p9)  ;;  %v461_v53 = vld [vmem:[%s2016_s1 + $0x18] sm:$0xf] (!%p394_p9) }
  0x1a   : > { %s438_s26 = scalar_select %p437_p10, %s1760_s21, 31  ;;  %796 = vperm.xlu1 %1560, %v722_v7   ;;  %v1105_v37 = vld [vmem:[%s2026_s11] sm:$0xff]  ;;  %v609_v48 = vld [vmem:[%s2017_s2 + $0x8] sm:$0xff]  ;;  %vm1507_vm5 = vmpackc.low %vm727_vm3, %vm1640_vm4 }
  0x1b   : > { %v1127_v40 = vld [vmem:[#allocation2] sm:$0x1]  ;;  %v459_v49 = vld [vmem:[%s2016_s1 + $0x8] sm:$0xff]  ;;  %vm1513_vm8 = vmpackc.low %vm906_vm7, %vm1640_vm4 }
  0x1c   : > { %s1212_s22 = sshll.u32 %s438_s26, 3  ;;  %v813_v54 = vld [vmem:[%s2020_s5] sm:$0xff]  ;;  %s435_s26 = scalar_lea.vmem [#allocation3], %s434_s18 }
  0x1d   : > { %s1787_s12 = scalar_lea.vmem %s2015_s0, %s1212_s22  ;;  %777 = vperm.xlu0 %1559, %v719_v15   ;;  %s1152_s14 = sshll.u32 %s435_s26, 4  ;;  %s1975_s14 = int_to_ptr.vmem [resolvable:$true] %s1152_s14 }
  0x1e   : > { %v442_v9 = vld [vmem:[%s1787_s12] sm:$0xff]  ;;  %v443_v10 = vld [vmem:[%s1787_s12 + $0x8] sm:$0xff]  ;;  %v444_v11 = vld [vmem:[%s1787_s12 + $0x10] sm:$0xff]  ;;  %782 = vperm.xlu1 %1560, %v720_v16   ;;  %s1140_s22 = scalar_lea.sflag [#allocation4], %s434_s18  ;;  %s1575_s23 = scalar_lea.vmem %s1975_s14, 16 }
  0x1f   : > { %v1406_v12 = vpack.c.bf16 %v443_v10, %v442_v9  ;;  %v445_v13 = vld [vmem:[%s1787_s12 + $0x18] sm:$0xff]  ;;  %v446_v17 = vld [vmem:[%s1787_s12 + $0x20] sm:$0xff]  ;;  %v447_v18 = vld [vmem:[%s1787_s12 + $0x28] sm:$0xff]  ;;  %p1576_p11 = scmp.ne.s32.totalorder %s1975_s14, %s1575_s23  ;;  %p1582_p0 = scmp.lt.s32.totalorder %s1975_s14, %s1580_s25 }
  0x20   : > { %v1412_v14 = vpack.c.bf16 %v445_v13, %v444_v11  ;;  %v1418_v21 = vpack.c.bf16 %v447_v18, %v446_v17  ;;  %v448_v24 = vld [vmem:[%s1787_s12 + $0x30] sm:$0xff]  ;;  %v449_v25 = vld [vmem:[%s1787_s12 + $0x38] sm:$0xff]  ;;  %v450_v31 = vld [vmem:[%s1787_s12 + $0x40] sm:$0xff]  ;;  %p1583_p1 = scmp.lt.s32.totalorder %s1581_s29, %s1575_s23 }
  0x21   : > { %1456 = vmatprep.subr.msk.bf16.mxu1 %vm1791_vm1, %v1406_v12  ;;  %1408 = vmatprep.subr.msk.bf16.mxu0 %vm1791_vm1, %v1406_v12  ;;  %v1424_v28 = vpack.c.bf16 %v449_v25, %v448_v24  ;;  %v451_v32 = vld [vmem:[%s1787_s12 + $0x48] sm:$0xff]  ;;  %v452_v38 = vld [vmem:[%s1787_s12 + $0x50] sm:$0xff]  ;;  %v453_v39 = vld [vmem:[%s1787_s12 + $0x58] sm:$0xff]  ;;  %p1577_p12 = pnand %p1576_p11, %p1750_p5 }
  0x22   : > { %1459 = vmatpush3.bf16.xpose.msk.msra.mxu1 %vm1791_vm1, %v1406_v12  ;;  %1411 = vmatpush3.bf16.xpose.msk.msra.mxu0 %vm1791_vm1, %v1406_v12  ;;  %v1430_v35 = vpack.c.bf16 %v451_v32, %v450_v31  ;;  %v1436_v41 = vpack.c.bf16 %v453_v39, %v452_v38  ;;  %v454_v42 = vld [vmem:[%s1787_s12 + $0x60] sm:$0xff]  ;;  %v455_v43 = vld [vmem:[%s1787_s12 + $0x68] sm:$0xff]  ;;  %v456_v45 = vld [vmem:[%s1787_s12 + $0x70] sm:$0xff]  ;;  %p1584_p2 = por %p1583_p1, %p1582_p0 }
  0x23   : > { %1462 = vmatprep.subr.msk.bf16.mxu1 %vm1791_vm1, %v1412_v14  ;;  %1414 = vmatprep.subr.msk.bf16.mxu0 %vm1791_vm1, %v1412_v14  ;;  %v1442_v44 = vpack.c.bf16 %v455_v43, %v454_v42  ;;  %v457_v46 = vld [vmem:[%s1787_s12 + $0x78] sm:$0xff]  ;;  %p1578_p13 = pneg %p1577_p12 }
  0x24   : > { %801 = vperm.xlu0 %1559, %v723_v19   ;;  %806 = vperm.xlu1 %1560, %v724_v20   ;;  %v1448_v47 = vpack.c.bf16 %v457_v46, %v456_v45 }
  0x25   : > { %p1585_p3 = pnand %p1584_p2, %p1578_p13 }
  0x28   : > { %938 = vperm.xlu0 %1559, %v902_v22   ;;  %943 = vperm.xlu1 %1560, %v903_v23  }
  0x2a   : > { %1465 = vmatpush3.bf16.xpose.msk.msra.mxu1 %vm1791_vm1, %v1412_v14  ;;  %1417 = vmatpush3.bf16.xpose.msk.msra.mxu0 %vm1791_vm1, %v1412_v14 }
  0x2b   : > { %1468 = vmatprep.subr.msk.bf16.mxu1 %vm1791_vm1, %v1418_v21  ;;  %1420 = vmatprep.subr.msk.bf16.mxu0 %vm1791_vm1, %v1418_v21 }
  0x2c   : > { %950 = vperm.xlu0 %1559, %v904_v26   ;;  %955 = vperm.xlu1 %1560, %v905_v27  }
  0x30   : > { %1088 = vperm.xlu0 %1559, %v1050_v29   ;;  %1083 = vperm.xlu1 %1560, %v1049_v30  }
  0x32   : > { %1471 = vmatpush3.bf16.xpose.msk.msra.mxu1 %vm1791_vm1, %v1418_v21  ;;  %1423 = vmatpush3.bf16.xpose.msk.msra.mxu0 %vm1791_vm1, %v1418_v21 }
  0x33   : > { %1474 = vmatprep.subr.msk.bf16.mxu1 %vm1791_vm1, %v1424_v28  ;;  %1426 = vmatprep.subr.msk.bf16.mxu0 %vm1791_vm1, %v1424_v28 }
  0x34   : > { %1100 = vperm.xlu0 %1559, %v1052_v33   ;;  %1095 = vperm.xlu1 %1560, %v1051_v34  }
  0x38   : > { %1114 = vperm.xlu0 %1559, %v1106_v36   ;;  %1109 = vperm.xlu1 %1560, %v1105_v37  }
  0x3a   : > { %1477 = vmatpush3.bf16.xpose.msk.msra.mxu1 %vm1791_vm1, %v1424_v28  ;;  %1429 = vmatpush3.bf16.xpose.msk.msra.mxu0 %vm1791_vm1, %v1424_v28 }
  0x3b   : > { %1480 = vmatprep.subr.msk.bf16.mxu1 %vm1791_vm1, %v1430_v35  ;;  %1432 = vmatprep.subr.msk.bf16.mxu0 %vm1791_vm1, %v1430_v35 }
  0x3c   : > { %1130 = vperm.xlu0 %1559, %v1127_v40  }
  0x42   : > { %1483 = vmatpush3.bf16.xpose.msk.msra.mxu1 %vm1791_vm1, %v1430_v35  ;;  %1435 = vmatpush3.bf16.xpose.msk.msra.mxu0 %vm1791_vm1, %v1430_v35 }
  0x43   : > { %1486 = vmatprep.subr.msk.bf16.mxu1 %vm1791_vm1, %v1436_v41  ;;  %1438 = vmatprep.subr.msk.bf16.mxu0 %vm1791_vm1, %v1436_v41 }
  0x4a   : > { %1489 = vmatpush3.bf16.xpose.msk.msra.mxu1 %vm1791_vm1, %v1436_v41  ;;  %1441 = vmatpush3.bf16.xpose.msk.msra.mxu0 %vm1791_vm1, %v1436_v41 }
  0x4b   : > { %1492 = vmatprep.subr.msk.bf16.mxu1 %vm1791_vm1, %v1442_v44  ;;  %1444 = vmatprep.subr.msk.bf16.mxu0 %vm1791_vm1, %v1442_v44 }
  0x52   : > { %1495 = vmatpush3.bf16.xpose.msk.msra.mxu1 %vm1791_vm1, %v1442_v44  ;;  %1447 = vmatpush3.bf16.xpose.msk.msra.mxu0 %vm1791_vm1, %v1442_v44 }
  0x53   : > { %1498 = vmatprep.subr.msk.bf16.mxu1 %vm1791_vm1, %v1448_v47  ;;  %1450 = vmatprep.subr.msk.bf16.mxu0 %vm1791_vm1, %v1448_v47 }
  0x5a   : > { %1501 = vmatpush3.bf16.xpose.msk.msra.mxu1 %vm1791_vm1, %v1448_v47  ;;  %1453 = vmatpush3.bf16.xpose.msk.msra.mxu0 %vm1791_vm1, %v1448_v47 }
  0x61   : > { %1383 = vmatmul.mubr.msk.f32.vlgmr.msra.gmra.mrb[0].mxu1 %vm462_vm0, %v609_v48  ;;  %1345 = vmatmul.mubr.msk.f32.vlgmr.msra.gmra.mrb[0].mxu0 %vm462_vm0, %v459_v49 }
  0x62   : > { %1385 = vmatprep.mubr.msk.f32.mxu1 %vm462_vm0, %v610_v50  ;;  %1347 = vmatprep.mubr.msk.f32.mxu0 %vm462_vm0, %v460_v51 }
  0x65   : > { %1386 = vmatmul.mubr.msk.f32.gmra.mrb[2].mxu1 %vm462_vm0, %v611_v52  ;;  %1348 = vmatmul.mubr.msk.f32.gmra.mrb[2].mxu0 %vm462_vm0, %v461_v53 }
  0x66   : > { %1396 = vmatprep.mubr.msk.f32.mxu0 %vm815_vm2, %v813_v54 }
  0x94   : > { %v768_v46 = vpop.permute.xlu0 %767 }
  0x95   : > { %v792_v48 = vpop.permute.xlu1 %791 }
  0x98   : > { %v773_v50 = vpop.permute.xlu0 %772 }
  0x99   : > { %v797_v51 = vpop.permute.xlu1 %796 }
  0x9c   : > { %v778_v52 = vpop.permute.xlu0 %777 }
  0x9d   : > { %v783_v53 = vpop.permute.xlu1 %782 }
 0x134   : > { %v1384_v55 = vpop.f32.mrb[0].mxu1  ;;  %v1346_v56 = vpop.f32.mrb[0].mxu0 }
 0x135   : > { %v696_v57 = vadd.f32 1.0, %v1384_v55  ;;  %v690_v58 = vpop.f32.mrb[1].mxu1  ;;  %v589_v59 = vpop.f32.mrb[1].mxu0  ;;  %v595_v3 = vadd.f32 1.0, %v1346_v56 }
 0x136   : > { %v691_v60 = vadd.f32 1.0, %v690_v58  ;;  %v590_v4 = vadd.f32 1.0, %v589_v59 }
 0x137   : > { %1561 = vrcp.f32 %v696_v57 }
 0x138   : > { %1563 = vrcp.f32 %v691_v60  ;;  %v1387_v61 = vpop.f32.mrb[2].mxu1  ;;  %v1349_v62 = vpop.f32.mrb[2].mxu0 }
 0x139   : > { %v706_v63 = vadd.f32 1.0, %v1387_v61  ;;  %v700_v0 = vpop.f32.mrb[3].mxu1  ;;  %v599_v1 = vpop.f32.mrb[3].mxu0  ;;  %v605_v8 = vadd.f32 1.0, %v1349_v62 }
 0x13a   : > { %v701_v2 = vadd.f32 1.0, %v700_v0  ;;  %v600_v10 = vadd.f32 1.0, %v599_v1  ;;  %v807_v0 = vpop.permute.xlu1 %806 }
 0x13b   : > { %1565 = vrcp.f32 %v706_v63  ;;  %v802_v63 = vpop.permute.xlu0 %801 }
 0x13c   : > { %1567 = vrcp.f32 %v701_v2 }
 0x141   : > { %v1562_v5 = vpop.eup %1561 }
 0x142   : > { %v1564_v6 = vpop.eup %1563  ;;  %v712_v7 = vmul.f32 %v1562_v5, %v595_v3 }
 0x143   : > { %v710_v9 = vmul.f32 %v1564_v6, %v590_v4 }
 0x144   : > { %v739_v11 = vmul.f32 %v712_v7, %v712_v7 }
 0x145   : > { %v1566_v12 = vpop.eup %1565  ;;  %v725_v13 = vadd.f32 %v712_v7, %v710_v9  ;;  %v738_v14 = vmul.f32 %v710_v9, %v710_v9 }
 0x146   : > { %v1568_v15 = vpop.eup %1567  ;;  %v716_v16 = vmul.f32 %v1566_v12, %v605_v8  ;;  %v960_v8 = vld [vmem:[%s2023_s8] sm:$0xff] }
 0x147   : > { %v742_v17 = vadd.f32 %v739_v11, %v738_v14  ;;  %v714_v18 = vmul.f32 %v1568_v15, %v600_v10  ;;  %1403 = vmatprep.mubr.msk.f32.mxu1 %vm962_vm6, %v960_v8 }
 0x148   : > { %v741_v19 = vmul.f32 %v716_v16, %v716_v16  ;;  %v728_v22 = vsel %vm727_vm3, %v716_v16, 0.0 }
 0x149   : > { %v726_v20 = vadd.f32 %v725_v13, %v714_v18  ;;  %v740_v21 = vmul.f32 %v714_v18, %v714_v18 }
 0x14a   : > { %v744_v25 = vsel %vm727_vm3, %v741_v19, 0.0 }
 0x14b   : > { %v729_v23 = vadd.f32 %v728_v22, %v726_v20  ;;  %v743_v24 = vadd.f32 %v742_v17, %v740_v21 }
 0x14d   : > { %v730_v26 = vrot.slane %v729_v23, 4  ;;  %v745_v27 = vadd.f32 %v744_v25, %v743_v24 }
 0x14f   : > { %v731_v28 = vadd.f32 %v730_v26, %v729_v23  ;;  %v746_v29 = vrot.slane %v745_v27, 4 }
 0x151   : > { %v732_v30 = vrot.slane %v731_v28, 2  ;;  %v747_v31 = vadd.f32 %v746_v29, %v745_v27 }
 0x153   : > { %v733_v32 = vadd.f32 %v732_v30, %v731_v28  ;;  %v748_v33 = vrot.slane %v747_v31, 2 }
 0x155   : > { %v734_v34 = vrot.slane %v733_v32, 1  ;;  %v749_v35 = vadd.f32 %v748_v33, %v747_v31 }
 0x157   : > { %v735_v36 = vadd.f32 %v734_v34, %v733_v32  ;;  %v750_v37 = vrot.slane %v749_v35, 1 }
 0x159   : > { %v737_v38 = vmul.f32 0.035714287, %v735_v36  ;;  %v751_v39 = vadd.f32 %v750_v37, %v749_v35 }
 0x15b   : > { %v752_v40 = vmul.f32 0.035714287, %v751_v39  ;;  %v753_v41 = vmul.f32 %v737_v38, %v737_v38  ;;  %v755_v42 = vsub.f32 %v710_v9, %v737_v38  ;;  %v756_v43 = vsub.f32 %v712_v7, %v737_v38  ;;  %v814_v7 = vld [vmem:[%s2020_s5 + $0x8] sm:$0x3f]  ;;  %v944_v39 = vpop.permute.xlu1 %943 }
 0x15c   : > { %v757_v44 = vsub.f32 %v714_v18, %v737_v38  ;;  %v758_v45 = vsub.f32 %v716_v16, %v737_v38  ;;  %v939_v38 = vpop.permute.xlu0 %938 }
 0x15d   : > { %v754_v47 = vsub.f32 %v752_v40, %v753_v41 }
 0x15f   : > { %v759_v49 = vadd.f32 1e-05, %v754_v47 }
 0x161   : > { %1569 = vrsqrt.f32 %v759_v49 }
 0x16b   : > { %v1570_v54 = vpop.eup %1569 }
 0x16c   : > { %v761_v55 = vmul.f32 %v1570_v54, %v755_v42  ;;  %v762_v56 = vmul.f32 %v1570_v54, %v756_v43  ;;  %v763_v57 = vmul.f32 %v1570_v54, %v757_v44  ;;  %v764_v58 = vmul.f32 %v1570_v54, %v758_v45  ;;  %v951_v45 = vpop.permute.xlu0 %950 }
 0x16e   : > { %v785_v59 = vmul.f32 %v768_v46, %v761_v55  ;;  %v786_v60 = vmul.f32 %v773_v50, %v762_v56  ;;  %v787_v61 = vmul.f32 %v778_v52, %v763_v57  ;;  %v788_v62 = vmul.f32 %v783_v53, %v764_v58  ;;  %v956_v46 = vpop.permute.xlu1 %955  ;;  %v961_v50 = vld [vmem:[%s2023_s8 + $0x8] sm:$0x3f] }
 0x170   : > { %v809_v1 = vadd.f32 %v792_v48, %v785_v59  ;;  %v810_v2 = vadd.f32 %v797_v51, %v786_v60  ;;  %v811_v3 = vadd.f32 %v802_v63, %v787_v61  ;;  %v812_v4 = vadd.f32 %v807_v0, %v788_v62 }
 0x172   : > { %v1502_v5 = vpack.c.bf16 %v810_v2, %v809_v1  ;;  %v1506_v6 = vpack.c.bf16 %v812_v4, %v811_v3 }
 0x174   : > { %1503 = vmatprep.subr.bf16.mxu0 %v1502_v5 }
 0x175   : > { %1505 = vmatpush3.bf16.msra.mxu0 %v1502_v5 }
 0x176   : > { %1508 = vmatprep.subr.msk.bf16.mxu0 %vm1507_vm5, %v1506_v6 }
 0x179   : > { %1511 = vmatpush3.bf16.msk.msra.mxu0 %vm1507_vm5, %v1506_v6 }
 0x17c   : > { %1397 = vmatmul.mubr.msk.f32.vlgmr.msra.gmra.mrb[4].mxu0 %vm815_vm2, %v814_v7 }
 0x24f   : > { %v1398_v9 = vpop.f32.mrb[4].mxu0 }
 0x250   : > { %v901_v10 = vmax.f32 %v1398_v9, 0.0  ;;  %v891_v11 = vpop.f32.mrb[5].mxu0 }
 0x251   : > { %v900_v12 = vmax.f32 %v891_v11, 0.0 }
 0x252   : > { %v907_v13 = vsel %vm906_vm7, %v901_v10, 0.0  ;;  %v918_v14 = vmul.f32 %v901_v10, %v901_v10 }
 0x253   : > { %v908_v15 = vadd.f32 %v907_v13, %v900_v12  ;;  %v917_v16 = vmul.f32 %v900_v12, %v900_v12 }
 0x254   : > { %v919_v17 = vsel %vm906_vm7, %v918_v14, 0.0 }
 0x255   : > { %v909_v18 = vrot.slane %v908_v15, 4  ;;  %v920_v19 = vadd.f32 %v919_v17, %v917_v16  ;;  %v1089_v16 = vpop.permute.xlu0 %1088  ;;  %v1084_v17 = vpop.permute.xlu1 %1083 }
 0x257   : > { %v910_v20 = vadd.f32 %v909_v18, %v908_v15  ;;  %v921_v21 = vrot.slane %v920_v19, 4 }
 0x259   : > { %v911_v22 = vrot.slane %v910_v20, 2  ;;  %v922_v23 = vadd.f32 %v921_v21, %v920_v19  ;;  %v1101_v19 = vpop.permute.xlu0 %1100 }
 0x25b   : > { %v912_v24 = vadd.f32 %v911_v22, %v910_v20  ;;  %v923_v25 = vrot.slane %v922_v23, 2  ;;  %v1096_v20 = vpop.permute.xlu1 %1095 }
 0x25d   : > { %v913_v26 = vrot.slane %v912_v24, 1  ;;  %v924_v27 = vadd.f32 %v923_v25, %v922_v23 }
 0x25f   : > { %v914_v28 = vadd.f32 %v913_v26, %v912_v24  ;;  %v925_v29 = vrot.slane %v924_v27, 1 }
 0x261   : > { %v916_v30 = vmul.f32 0.071428575, %v914_v28  ;;  %v926_v31 = vadd.f32 %v925_v29, %v924_v27  ;;  %v1115_v27 = vpop.permute.xlu0 %1114  ;;  %v1110_v28 = vpop.permute.xlu1 %1109 }
 0x263   : > { %v927_v32 = vmul.f32 0.071428575, %v926_v31  ;;  %v928_v33 = vmul.f32 %v916_v30, %v916_v30  ;;  %v930_v34 = vsub.f32 %v900_v12, %v916_v30  ;;  %v931_v35 = vsub.f32 %v901_v10, %v916_v30 }
 0x265   : > { %v929_v36 = vsub.f32 %v927_v32, %v928_v33  ;;  %v1133_v32 = vlaneseq }
 0x267   : > { %v932_v37 = vadd.f32 1e-05, %v929_v36 }
 0x269   : > { %1571 = vrsqrt.f32 %v932_v37 }
 0x273   : > { %v1572_v40 = vpop.eup %1571 }
 0x274   : > { %v934_v41 = vmul.f32 %v1572_v40, %v930_v34  ;;  %v935_v42 = vmul.f32 %v1572_v40, %v931_v35  ;;  %v1134_v35 = vshrl.u32 %v1133_v32, 7  ;;  %v1131_v40 = vpop.permute.xlu0 %1130 }
 0x276   : > { %v946_v43 = vmul.f32 %v939_v38, %v934_v41  ;;  %v947_v44 = vmul.f32 %v944_v39, %v935_v42  ;;  %v1135_v38 = vsub.s32 0, %v1134_v35 }
 0x278   : > { %v958_v47 = vadd.f32 %v951_v45, %v946_v43  ;;  %v959_v48 = vadd.f32 %v956_v46, %v947_v44  ;;  %v1136_v42 = vrot.slane %v1131_v40, %v1135_v38 }
 0x27a   : > { %v1512_v49 = vpack.c.bf16 %v959_v48, %v958_v47 }
 0x27c   : > { %1514 = vmatprep.subr.msk.bf16.mxu1 %vm1513_vm8, %v1512_v49 }
 0x27d   : > { %1517 = vmatpush3.bf16.msk.msra.mxu1 %vm1513_vm8, %v1512_v49 }
 0x280   : > { %1404 = vmatmul.mubr.msk.f32.vlgmr.msra.gmra.mrb[4].mxu1 %vm962_vm6, %v961_v50 }
 0x353   : > { %v1405_v51 = vpop.f32.mrb[4].mxu1 }
 0x354   : > { %v1048_v52 = vmax.f32 %v1405_v51, 0.0  ;;  %v1038_v53 = vpop.f32.mrb[5].mxu1 }
 0x355   : > { %v1047_v54 = vmax.f32 %v1038_v53, 0.0 }
 0x356   : > { %v1053_v55 = vsel %vm906_vm7, %v1048_v52, 0.0  ;;  %v1063_v56 = vmul.f32 %v1048_v52, %v1048_v52 }
 0x357   : > { %v1054_v57 = vadd.f32 %v1053_v55, %v1047_v54  ;;  %v1062_v58 = vmul.f32 %v1047_v54, %v1047_v54 }
 0x358   : > { %v1064_v59 = vsel %vm906_vm7, %v1063_v56, 0.0 }
 0x359   : > { %v1055_v60 = vrot.slane %v1054_v57, 4  ;;  %v1065_v61 = vadd.f32 %v1064_v59, %v1062_v58 }
 0x35b   : > { %v1056_v62 = vadd.f32 %v1055_v60, %v1054_v57  ;;  %v1066_v63 = vrot.slane %v1065_v61, 4 }
 0x35d   : > { %v1057_v0 = vrot.slane %v1056_v62, 2  ;;  %v1067_v1 = vadd.f32 %v1066_v63, %v1065_v61 }
 0x35f   : > { %v1058_v2 = vadd.f32 %v1057_v0, %v1056_v62  ;;  %v1068_v3 = vrot.slane %v1067_v1, 2 }
 0x361   : > { %v1059_v4 = vrot.slane %v1058_v2, 1  ;;  %v1069_v5 = vadd.f32 %v1068_v3, %v1067_v1 }
 0x363   : > { %v1060_v6 = vadd.f32 %v1059_v4, %v1058_v2  ;;  %v1070_v7 = vrot.slane %v1069_v5, 1 }
 0x365   : > { %v1061_v8 = vmul.f32 0.071428575, %v1060_v6  ;;  %v1071_v9 = vadd.f32 %v1070_v7, %v1069_v5 }
 0x367   : > { %v1072_v10 = vmul.f32 0.071428575, %v1071_v9  ;;  %v1073_v11 = vmul.f32 %v1061_v8, %v1061_v8  ;;  %v1075_v12 = vsub.f32 %v1047_v54, %v1061_v8  ;;  %v1076_v13 = vsub.f32 %v1048_v52, %v1061_v8 }
 0x369   : > { %v1074_v14 = vsub.f32 %v1072_v10, %v1073_v11 }
 0x36b   : > { %v1077_v15 = vadd.f32 1e-05, %v1074_v14 }
 0x36d   : > { %1573 = vrsqrt.f32 %v1077_v15 }
 0x377   : > { %v1574_v18 = vpop.eup %1573 }
 0x378   : > { %v1079_v21 = vmul.f32 %v1574_v18, %v1075_v12  ;;  %v1080_v22 = vmul.f32 %v1574_v18, %v1076_v13 }
 0x37a   : > { %v1091_v23 = vmul.f32 %v1084_v17, %v1079_v21  ;;  %v1092_v24 = vmul.f32 %v1089_v16, %v1080_v22 }
 0x37c   : > { %v1103_v25 = vadd.f32 %v1096_v20, %v1091_v23  ;;  %v1104_v26 = vadd.f32 %v1101_v19, %v1092_v24 }
 0x37e   : > { %v1117_v29 = vmul.f32 %v1110_v28, %v1103_v25  ;;  %v1118_v30 = vmul.f32 %v1115_v27, %v1104_v26 }
 0x380   : > { %v1119_v31 = vsel %vm906_vm7, %v1118_v30, 0.0 }
 0x381   : > { %v1120_v33 = vadd.f32 %v1119_v31, %v1117_v29 }
 0x383   : > { %v1121_v34 = vrot.slane %v1120_v33, 4 }
 0x385   : > { %v1122_v36 = vadd.f32 %v1121_v34, %v1120_v33 }
 0x387   : > { %v1123_v37 = vrot.slane %v1122_v36, 2 }
 0x389   : > { %v1124_v39 = vadd.f32 %v1123_v37, %v1122_v36 }
 0x38b   : > { %v1125_v41 = vrot.slane %v1124_v39, 1 }
 0x38d   : > { %v1126_v43 = vadd.f32 %v1125_v41, %v1124_v39 }
 0x38f   : > { %v1137_v44 = vadd.f32 %v1136_v42, %v1126_v43 }
 0x391   : > { %1138 = vst [vmem:[%s435_s26] sm:$0x1] %v1137_v44 }
 0x392   : > { %1588 = shalt.err (!%p1585_p3)
}
 0x393   : > { %s1589_s21 = scalar_lea.hbm %s1973_s17, 16  ;;  %s1593_s26 = scalar_lea.hbm %s2028_s13, 32 }
 0x394   : > { %p1590_p4 = scmp.ne.s32.totalorder %s1973_s17, %s1589_s21  ;;  %p1594_p9 = scmp.lt.u32.totalorder %s1973_s17, %s2028_s13 }
 0x395   : > { %p1595_p10 = scmp.lt.u32.totalorder %s1593_s26, %s1589_s21  ;;  %p1597_p12 = scmp.lt.u32.totalorder %s1589_s21, %s1973_s17 }
 0x396   : > { %p1591_p7 = pnand %p1590_p4, %p1750_p5 }
 0x397   : > { %p1596_p11 = por %p1595_p10, %p1594_p9 }
 0x398   : > { %p1592_p8 = pneg %p1591_p7 }
 0x399   : > { %p1598_p13 = por %p1597_p12, %p1596_p11 }
 0x39b   : > { %p1599_p0 = pnand %p1598_p13, %p1592_p8 }
 0x39d   : > { %1602 = shalt.err (!%p1599_p0)
}
 0x39e   : > { %1518 = dma.vmem_to_hbm [thread:$0]  (%p1750_p5), %s1975_s14, 16, %s1973_s17, %s1140_s22  }
 0x39f PF: > { %p1524_p1 = scmp.ge.s32.totalorder %s1637_s30, 2  ;;  %s1164_s23 = sand.u32 1, %s1625_s27  }
 0x3a0   : > { %s1165_s24 = scalar_lea.sflag [#allocation4], %s1164_s23 }
 0x3a1   : > { %p1521_p2 = pnand %p1524_p1, %p1754_p6 }
 0x3a3   : > { %1620 = dma.done.wait (!%p1521_p2), %s1165_s24, 16  }
 0x3a4   : > { %1622 = vsyncadd (!%p1521_p2), %s1165_s24, 4294967280  ;;  %s2039_s30 = sld [smem:[#allocation7_spill]]  ;;  %s2040_s25 = sld [smem:[#allocation6_spill]] }
 0x3a5   : > { %s2041_s29 = sld [smem:[#allocation8_spill]]  ;;  %s2042_s27 = smov %s1629_s28 }
 0x3aa   : > { %p25_p3 = scmp.ge.s32.totalorder %s2039_s30, 4   ;;  %s2043_s28 = smov %s2040_s25 }
 0x3ac   :  { %27 = sbr.rel (!%p25_p3) target bundleno = 6 (0x6), region = 107 }
 0x3b3   :  { %1169 = vsyncpa [#allocation4], 1 }
 0x3b4   :  { %1171 = vsyncpa [#allocation4 + $0x1], 1 }

</bundles_post_ra>
